<compile_context>
chip_gen: v6e
topology: v6e:2x2x1
jax: 0.10.0
libtpu: 0.0.40
codegen_flags: <defaults>
</compile_context>

<pallas_src>
import jax
import jax.numpy as jnp
from jax.experimental import pallas as pl
from jax.experimental.pallas import tpu as pltpu

_LANES = 128                       # vreg lane width
_SUBLANES = 8                      # vreg sublane count (f32)
_TILE_ELEMS = _LANES * _SUBLANES   # 1024: minimal padding granule
_TM_MAX = 2048                     # rows per tile -> 2048*128*4 B = 1 MiB buffer


def logreg_kernel(w_ref, b_ref, x_ref, o_ref):
    # w_ref, b_ref: SMEM scalars; x_ref, o_ref: (tm, 128) f32 tiles in VMEM.
    w = w_ref[0]
    b = b_ref[0]
    z = x_ref[...] * w + b                     # Linear(1, 1): x @ W^T + b (VPU)
    # sigmoid(z) == 0.5 * tanh(z / 2) + 0.5 -- one EUP op per element.
    o_ref[...] = 0.5 * jnp.tanh(0.5 * z) + 0.5


def _dimension_semantics():
    """CORE_PARALLEL on v7x (2 TensorCores), plain 'parallel' otherwise."""
    try:
        kind = jax.devices()[0].device_kind.lower()
    except Exception:
        kind = ""
    if "v7" in kind:
        return (getattr(pltpu, "CORE_PARALLEL", "parallel"),)
    return ("parallel",)


def logistic_regression_forward(x, weight, bias):
    """x: (N, 1) f32, weight: (1, 1) f32, bias: (1,) f32 -> (N, 1) f32."""
    orig_shape = x.shape
    n = x.size                                    # total elements (N * 1)

    x_flat = x.reshape(-1).astype(jnp.float32)

    # Minimal lane-dense padding: round up to a multiple of 1024 elements
    # (8 sublanes x 128 lanes).  Skip the pad/slice HBM copies when already
    # aligned -- the reshape to (m, 128) is then a free metadata change.
    n_pad = -(-n // _TILE_ELEMS) * _TILE_ELEMS
    needs_pad = n_pad != n
    if needs_pad:
        x_flat = jnp.pad(x_flat, (0, n_pad - n))
    m = n_pad // _LANES                           # multiple of 8
    x_slab = x_flat.reshape(m, _LANES)

    tm = min(_TM_MAX, m)                          # multiple of 8 either way
    grid = (pl.cdiv(m, tm),)                      # partial last block is masked

    w_flat = weight.reshape((1,)).astype(jnp.float32)   # (1,1) -> (1,) for SMEM
    b_flat = bias.reshape((1,)).astype(jnp.float32)

    out_slab = pl.pallas_call(
        logreg_kernel,
        out_shape=jax.ShapeDtypeStruct((m, _LANES), jnp.float32),
        grid=grid,
        in_specs=[
            pl.BlockSpec(memory_space=pltpu.MemorySpace.SMEM),   # weight scalar
            pl.BlockSpec(memory_space=pltpu.MemorySpace.SMEM),   # bias scalar
            pl.BlockSpec((tm, _LANES), lambda i: (i, 0)),        # x tile
        ],
        out_specs=pl.BlockSpec((tm, _LANES), lambda i: (i, 0)),  # y tile
        compiler_params=pltpu.CompilerParams(
            dimension_semantics=_dimension_semantics(),
        ),
    )(w_flat, b_flat, x_slab)

    out_flat = out_slab.reshape(-1)
    if needs_pad:
        out_flat = out_flat[:n]                   # drop padded tail
    return out_flat.reshape(orig_shape)


if __name__ == "__main__":
    key = jax.random.PRNGKey(0)
    k_x, k_w, k_b = jax.random.split(key, 3)

    # Deterministic parameter init (same shapes as torch.nn.Linear(1, 1)).
    weight = jax.random.uniform(k_w, (1, 1), dtype=jnp.float32, minval=-1.0, maxval=1.0)
    bias = jax.random.uniform(k_b, (1,), dtype=jnp.float32, minval=-1.0, maxval=1.0)

    # Small primary example: batch of 8 samples, 1 feature each.
    N = 8
    x = jax.random.normal(k_x, (N, 1), dtype=jnp.float32)
    y = logistic_regression_forward(x, weight, bias)
    jax.block_until_ready(y)

    y_ref = jax.nn.sigmoid(x @ weight.T + bias)
    assert y.shape == (N, 1) and y.dtype == jnp.float32
    assert jnp.allclose(y, y_ref, atol=1e-5), "mismatch vs reference (N=8)"

    # Also exercise the unaligned / padded path.
    N2 = 1000
    x2 = jax.random.normal(k_x, (N2, 1), dtype=jnp.float32)
    y2 = logistic_regression_forward(x2, weight, bias)
    jax.block_until_ready(y2)
    y2_ref = jax.nn.sigmoid(x2 @ weight.T + bias)
    assert y2.shape == (N2, 1)
    assert jnp.allclose(y2, y2_ref, atol=1e-5), "mismatch vs reference (N=1000)"

    print("KERNEL_OK")
</pallas_src>

<mosaic_0001>
module attributes {stable_mosaic.version = 11 : i64} {
  func.func @logreg_kernel(%arg0: i32, %arg1: memref<1xf32, #tpu.memory_space<smem>>, %arg2: memref<1xf32, #tpu.memory_space<smem>>, %arg3: memref<8x128xf32, #tpu.memory_space<vmem>>, %arg4: memref<8x128xf32, #tpu.memory_space<vmem>>) attributes {dimension_semantics = [#tpu.dimension_semantics<parallel>], iteration_bounds = array<i64: 1>, scalar_prefetch = 0 : i64, scratch_operands = 0 : i64, tpu.core_type = #tpu.core_type<tc>, window_params = [{transform_indices = @transform_0, window_bounds = array<i64: 1>}, {transform_indices = @transform_1, window_bounds = array<i64: 1>}, {transform_indices = @transform_2, window_bounds = array<i64: 8, 128>}, {transform_indices = @transform_3, window_bounds = array<i64: 8, 128>}]} {
    %c0 = arith.constant 0 : index
    %0 = memref.load %arg1[%c0] : memref<1xf32, #tpu.memory_space<smem>>
    %c0_0 = arith.constant 0 : index
    %1 = memref.load %arg2[%c0_0] : memref<1xf32, #tpu.memory_space<smem>>
    %c0_1 = arith.constant 0 : index
    %c0_2 = arith.constant 0 : index
    %2 = vector.load %arg3[%c0_1, %c0_2] : memref<8x128xf32, #tpu.memory_space<vmem>>, vector<8x128xf32>
    %3 = vector.broadcast %0 : f32 to vector<8x128xf32>
    %4 = arith.mulf %2, %3 : vector<8x128xf32>
    %5 = vector.broadcast %1 : f32 to vector<8x128xf32>
    %6 = arith.addf %4, %5 : vector<8x128xf32>
    %cst = arith.constant 5.000000e-01 : f32
    %7 = vector.broadcast %cst : f32 to vector<8x128xf32>
    %8 = arith.mulf %7, %6 : vector<8x128xf32>
    %9 = math.tanh %8 : vector<8x128xf32>
    %cst_3 = arith.constant 5.000000e-01 : f32
    %10 = vector.broadcast %cst_3 : f32 to vector<8x128xf32>
    %11 = arith.mulf %10, %9 : vector<8x128xf32>
    %cst_4 = arith.constant 5.000000e-01 : f32
    %12 = vector.broadcast %cst_4 : f32 to vector<8x128xf32>
    %13 = arith.addf %11, %12 : vector<8x128xf32>
    %c0_5 = arith.constant 0 : index
    %c0_6 = arith.constant 0 : index
    %14 = vector.load %arg4[%c0_5, %c0_6] : memref<8x128xf32, #tpu.memory_space<vmem>>, vector<8x128xf32>
    tpu.vector_store %arg4[%c0_5, %c0_6], %13 {strides = array<i32>} : memref<8x128xf32, #tpu.memory_space<vmem>>, vector<8x128xf32>,
    return
  }
  func.func @transform_0(%arg0: i32) -> i32 {
    %c0_i32 = arith.constant 0 : i32
    %c0_i32_0 = arith.constant 0 : i32
    return %c0_i32 : i32
  }
  func.func @transform_1(%arg0: i32) -> i32 {
    %c0_i32 = arith.constant 0 : i32
    %c0_i32_0 = arith.constant 0 : i32
    return %c0_i32 : i32
  }
  func.func @transform_2(%arg0: i32) -> (i32, i32) {
    %c0_i32 = arith.constant 0 : i32
    %c0_i32_0 = arith.constant 0 : i32
    return %arg0, %c0_i32 : i32, i32
  }
  func.func @transform_3(%arg0: i32) -> (i32, i32) {
    %c0_i32 = arith.constant 0 : i32
    %c0_i32_0 = arith.constant 0 : i32
    return %arg0, %c0_i32 : i32, i32
  }
}

</mosaic_0001>

<bundles_post_ra>
// kernel: tpu_custom_call.1
= control target key start
LH: loop header
LB: loop body
LE: loop exit
PB: predicated region body
PF: predicated region fallthrough
CT: control target
= control target key end

     0   :  { %10 = vsyncpa [#allocation5], 0  ;;  %s138_s0 = inlined_call_operand.<no memory space> [shape: f32[1], index: 0, kind: input, shape index: {}]   ;;  %s139_s1 = inlined_call_operand.<no memory space> [shape: f32[1], index: 1, kind: input, shape index: {}]   ;;  %s140_s2 = inlined_call_operand.hbm [shape: f32[8,128], index: 2, kind: input, shape index: {}]   ;;  %s141_s3 = inlined_call_operand.hbm [shape: f32[8,128], index: 3, kind: output, shape index: {}]  }
   0x1   :  { %11 = vsyncpa [#allocation6], 0  ;;  %s104_s12 = smov [#allocation4]  }
   0x2   :  { %s22_s13 = sshll.u32 %s104_s12, 4  ;;  %s23_s13 = int_to_ptr.vmem [resolvable:$true] %s22_s13 }
   0x3   :  { %s68_s14 = scalar_lea.vmem %s23_s13, 128  ;;  %p73_p1 = scmp.lt.s32.totalorder %s23_s13, %s23_s13 }
   0x4   :  { %p69_p0 = scmp.ne.s32.totalorder %s23_s13, %s68_s14  ;;  %p74_p2 = scmp.lt.s32.totalorder %s68_s14, %s68_s14 }
   0x6   :  { %p75_p3 = por %p74_p2, %p73_p1 }
   0x8   :  { %p76_p4 = pnand %p75_p3, %p69_p0 }
   0xa   :  { %79 = shalt.err (!%p76_p4)
}
   0xb   :  { %25 = dma.hbm_to_vmem [thread:$0]  %s140_s2, 128, %s23_s13, [#allocation5]  }
   0xc   :  { %100 = dma.done.wait [#allocation5], 128  }
   0xd   :  { %101 = vsyncadd [#allocation5], 4294967168  ;;  %v32_v0 = vstv %s138_s0  ;;  %v31_v1 = vld [vmem:[#allocation4] sm:$0xff]  ;;  %v34_v2 = vstv %s139_s1  ;;  %s105_s21 = smov [#allocation7]  }
   0xe   :  { %v33_v3 = vmul.f32 %v32_v0, %v31_v1  ;;  %s47_s22 = sshll.u32 %s105_s21, 4  ;;  %s48_s22 = int_to_ptr.vmem [resolvable:$true] %s47_s22 }
   0xf   :  { %s80_s2 = scalar_lea.vmem %s48_s22, 128  ;;  %p85_p6 = scmp.lt.s32.totalorder %s48_s22, %s48_s22 }
  0x10   :  { %v35_v4 = vadd.f32 %v34_v2, %v33_v3  ;;  %p81_p5 = scmp.ne.s32.totalorder %s48_s22, %s80_s2  ;;  %p86_p7 = scmp.lt.s32.totalorder %s80_s2, %s80_s2 }
  0x12   :  { %v36_v5 = vmul.f32 0.5, %v35_v4  ;;  %p87_p8 = por %p86_p7, %p85_p6 }
  0x14   :  { %58 = vtanh.f32 %v36_v5  ;;  %p88_p9 = pnand %p87_p8, %p81_p5 }
  0x21   :  { %v59_v6 = vpop.eup %58 }
  0x22   :  { %v38_v7 = vmul.f32 0.5, %v59_v6 }
  0x24   :  { %v39_v8 = vadd.f32 0.5, %v38_v7 }
  0x26   :  { %40 = vst [vmem:[#allocation7] sm:$0xff] %v39_v8 }
  0x27   :  { %91 = shalt.err (!%p88_p9)
}
  0x28   :  { %50 = dma.vmem_to_hbm [thread:$0]  %s48_s22, 128, %s141_s3, [#allocation6]  }
  0x29   :  { %102 = dma.done.wait [#allocation6], 128  }
  0x2a   :  { %103 = vsyncadd [#allocation6], 4294967168 }
  0x2b   :  { %54 = vsyncpa [#allocation5], 1 }
  0x2c   :  { %55 = vsyncpa [#allocation6], 1 }

</bundles_post_ra>
